<compile_context>
chip_gen: v7x
topology: tpu7x:2x2x1
jax: 0.10.0
libtpu: 0.0.40
codegen_flags: <defaults>
</compile_context>

<pallas_src>
import functools
import math

import jax
import jax.numpy as jnp
import numpy as np
from jax.experimental import pallas as pl
from jax.experimental.pallas import tpu as pltpu


def mha_kernel(q_ref, k_ref, v_ref, mask_ref,
               wq_ref, bq_ref, wk_ref, bk_ref, wv_ref, bv_ref,
               wfc_ref, bfc_ref, gamma_ref, beta_ref,
               out_ref, attn_ref,
               *, n_head, d_k, d_v, inv_temperature, ln_eps):
    f32 = jnp.float32
    bf16 = jnp.bfloat16

    x_q = q_ref[0]                    # (tq, d_model)  f32 (needed for residual)
    x_k = k_ref[0]                    # (L_k, d_model) bf16
    x_v = v_ref[0]                    # (L_k, d_model) bf16
    tq = x_q.shape[0]
    d_model = x_q.shape[1]

    # Additive mask bias computed ONCE for all heads (hoisted out of head loop).
    # Large finite negative instead of -inf: exp underflows to exactly 0 for
    # masked keys and fully-masked rows don't produce NaN.
    neg_bias = mask_ref[0].astype(f32) * f32(-1e30)       # (tq, L_k)

    # QKV projections: bf16 MXU inputs, f32 accumulation; bias add in f32.
    # 1/temperature folded into q_proj once (cheaper than scaling each score
    # matrix, and a multiply instead of a divide).
    q_proj = (jnp.dot(x_q.astype(bf16), wq_ref[...],
                      preferred_element_type=f32) + bq_ref[0]) * f32(inv_temperature)
    k_proj = jnp.dot(x_k, wk_ref[...], preferred_element_type=f32) + bk_ref[0]
    v_proj = jnp.dot(x_v, wv_ref[...], preferred_element_type=f32) + bv_ref[0]

    # Per-head attention; FC output accumulated directly (no lane-dim concat).
    fc_acc = jnp.zeros((tq, d_model), f32)
    for h in range(n_head):           # static python loop (n_head small)
        qh = q_proj[:, h * d_k:(h + 1) * d_k].astype(bf16)   # (tq, d_k)
        kh = k_proj[:, h * d_k:(h + 1) * d_k].astype(bf16)   # (L_k, d_k)
        vh = v_proj[:, h * d_v:(h + 1) * d_v].astype(bf16)   # (L_k, d_v)

        scores = jnp.dot(qh, kh.T, preferred_element_type=f32) + neg_bias

        s_max = jnp.max(scores, axis=-1, keepdims=True)
        e = jnp.exp(scores - s_max)
        denom = jnp.sum(e, axis=-1, keepdims=True)
        attn = e * pl.reciprocal(denom, approx=True)          # EUP, not VALU div

        # Head-major attention-weights output (free reshape in the wrapper).
        # TODO(synk): could be dropped or emitted bf16 if the caller allows.
        attn_ref[h, 0] = attn.astype(attn_ref.dtype)

        # TODO(synk): attention dropout skipped (eval-mode identity).
        head_out = jnp.dot(attn.astype(bf16), vh, preferred_element_type=f32)
        fc_acc = fc_acc + jnp.dot(head_out.astype(bf16),
                                  wfc_ref[h * d_v:(h + 1) * d_v, :],
                                  preferred_element_type=f32)

    fc_out = fc_acc + bfc_ref[0]
    # TODO(synk): output dropout skipped (eval-mode identity).

    # Residual + LayerNorm (f32 elementwise math on every chip generation).
    y = fc_out + x_q
    mean = jnp.mean(y, axis=-1, keepdims=True)
    var = jnp.mean((y - mean) ** 2, axis=-1, keepdims=True)
    norm = (y - mean) * jax.lax.rsqrt(var + ln_eps)
    out_ref[0] = (norm * gamma_ref[0] + beta_ref[0]).astype(out_ref.dtype)


def multi_head_attention(q, k, v, mask, params, *, n_head, d_k, d_v):
    B, L_q, d_model = q.shape
    L_k = k.shape[1]

    wq, bq, wk, bk, wv, bv, wfc, bfc, gamma, beta = params

    bf16 = jnp.bfloat16
    # Weights in bf16 (MXU inputs, halves weight DMA); vector params stay f32.
    wq_b, wk_b, wv_b, wfc_b = (w.astype(bf16) for w in (wq, wk, wv, wfc))
    bq2 = bq.reshape(1, -1).astype(jnp.float32)
    bk2 = bk.reshape(1, -1).astype(jnp.float32)
    bv2 = bv.reshape(1, -1).astype(jnp.float32)
    bfc2 = bfc.reshape(1, -1).astype(jnp.float32)
    gamma2 = gamma.reshape(1, -1).astype(jnp.float32)
    beta2 = beta.reshape(1, -1).astype(jnp.float32)

    # q stays f32 (needed exactly for the residual / LayerNorm path);
    # k, v only feed MXU matmuls -> ship them as bf16.
    k_b = k.astype(bf16)
    v_b = v.astype(bf16)
    # Mask shipped as int8 (4x less HBM traffic than f32).
    mask_i8 = mask.astype(jnp.int8)

    # Query-tile grid axis bounds VMEM independently of L_q (flash-style tiling
    # of the query dimension; K/V stay resident per batch element).
    tq = min(L_q, 128)
    grid = (B, pl.cdiv(L_q, tq))

    kernel = functools.partial(
        mha_kernel, n_head=n_head, d_k=d_k, d_v=d_v,
        inv_temperature=1.0 / float(math.sqrt(d_k)), ln_eps=1e-5)

    full = lambda arr: pl.BlockSpec(arr.shape, lambda b, qi: (0,) * arr.ndim)

    out, attn = pl.pallas_call(
        kernel,
        grid=grid,
        in_specs=[
            pl.BlockSpec((1, tq, d_model), lambda b, qi: (b, qi, 0)),   # q
            pl.BlockSpec((1, L_k, d_model), lambda b, qi: (b, 0, 0)),   # k
            pl.BlockSpec((1, L_k, d_model), lambda b, qi: (b, 0, 0)),   # v
            pl.BlockSpec((1, tq, L_k), lambda b, qi: (b, qi, 0)),       # mask
            full(wq_b), full(bq2), full(wk_b), full(bk2),
            full(wv_b), full(bv2), full(wfc_b), full(bfc2),
            full(gamma2), full(beta2),
        ],
        out_specs=[
            pl.BlockSpec((1, tq, d_model), lambda b, qi: (b, qi, 0)),
            # Head-major attention weights: wrapper reshape is a free view.
            pl.BlockSpec((n_head, 1, tq, L_k), lambda b, qi: (0, b, qi, 0)),
        ],
        out_shape=(
            jax.ShapeDtypeStruct((B, L_q, d_model), jnp.float32),
            jax.ShapeDtypeStruct((n_head, B, L_q, L_k), jnp.float32),
        ),
        compiler_params=pltpu.CompilerParams(
            dimension_semantics=("parallel", "parallel")),
    )(q, k_b, v_b, mask_i8, wq_b, bq2, wk_b, bk2, wv_b, bv2,
      wfc_b, bfc2, gamma2, beta2)

    # PyTorch attn layout: (n_head * B, L_q, L_k), head-major -> pure view.
    attn = attn.reshape(n_head * B, L_q, L_k)
    return out, attn


def reference_mha(q, k, v, mask, params, *, n_head, d_k, d_v):
    """Pure-JAX f32 reference mirroring the PyTorch forward (eval mode)."""
    wq, bq, wk, bk, wv, bv, wfc, bfc, gamma, beta = params
    B, L_q, d_model = q.shape
    L_k = k.shape[1]
    temperature = np.power(d_k, 0.5)

    qp = (q @ wq + bq).reshape(B, L_q, n_head, d_k)
    kp = (k @ wk + bk).reshape(B, L_k, n_head, d_k)
    vp = (v @ wv + bv).reshape(B, L_k, n_head, d_v)
    qp = jnp.transpose(qp, (2, 0, 1, 3)).reshape(-1, L_q, d_k)
    kp = jnp.transpose(kp, (2, 0, 1, 3)).reshape(-1, L_k, d_k)
    vp = jnp.transpose(vp, (2, 0, 1, 3)).reshape(-1, L_k, d_v)
    m = jnp.tile(mask, (n_head, 1, 1))

    scores = jnp.einsum("bqd,bkd->bqk", qp, kp) / temperature
    scores = jnp.where(m, -jnp.inf, scores)
    attn = jax.nn.softmax(scores, axis=-1)
    out = jnp.einsum("bqk,bkd->bqd", attn, vp)
    out = out.reshape(n_head, B, L_q, d_v)
    out = jnp.transpose(out, (1, 2, 0, 3)).reshape(B, L_q, n_head * d_v)
    out = out @ wfc + bfc
    y = out + q
    mean = jnp.mean(y, axis=-1, keepdims=True)
    var = jnp.mean((y - mean) ** 2, axis=-1, keepdims=True)
    out = (y - mean) / jnp.sqrt(var + 1e-5) * gamma + beta
    return out, attn


if __name__ == "__main__":
    # Small shapes consistent with the module.
    B, L, d_model = 2, 8, 32
    n_head, d_k, d_v = 2, 16, 16

    key = jax.random.PRNGKey(0)
    ks = jax.random.split(key, 12)

    q = jax.random.normal(ks[0], (B, L, d_model), jnp.float32)
    k = jax.random.normal(ks[1], (B, L, d_model), jnp.float32)
    v = jax.random.normal(ks[2], (B, L, d_model), jnp.float32)

    # Padding-style mask: last 2 key positions masked for every query.
    mask = jnp.zeros((B, L, L), jnp.bool_)
    mask = mask.at[:, :, -2:].set(True)

    # Deterministic parameter init (weights stored as (in, out)).
    s = 0.1
    wq = s * jax.random.normal(ks[3], (d_model, n_head * d_k), jnp.float32)
    bq = s * jax.random.normal(ks[4], (n_head * d_k,), jnp.float32)
    wk = s * jax.random.normal(ks[5], (d_model, n_head * d_k), jnp.float32)
    bk = s * jax.random.normal(ks[6], (n_head * d_k,), jnp.float32)
    wv = s * jax.random.normal(ks[7], (d_model, n_head * d_v), jnp.float32)
    bv = s * jax.random.normal(ks[8], (n_head * d_v,), jnp.float32)
    wfc = s * jax.random.normal(ks[9], (n_head * d_v, d_model), jnp.float32)
    bfc = s * jax.random.normal(ks[10], (d_model,), jnp.float32)
    gamma = jnp.ones((d_model,), jnp.float32)
    beta = jnp.zeros((d_model,), jnp.float32)
    params = (wq, bq, wk, bk, wv, bv, wfc, bfc, gamma, beta)

    out, attn = multi_head_attention(q, k, v, mask, params,
                                     n_head=n_head, d_k=d_k, d_v=d_v)
    out = jax.block_until_ready(out)
    attn = jax.block_until_ready(attn)

    out_ref, attn_ref = reference_mha(q, k, v, mask, params,
                                      n_head=n_head, d_k=d_k, d_v=d_v)
    # bf16 MXU inputs + approx reciprocal -> slightly looser tolerances than
    # an all-f32 comparison.
    np.testing.assert_allclose(np.asarray(out), np.asarray(out_ref),
                               rtol=2e-2, atol=2e-2)
    np.testing.assert_allclose(np.asarray(attn), np.asarray(attn_ref),
                               rtol=2e-2, atol=2e-2)

    print("KERNEL_OK")
</pallas_src>

<mosaic_0001>
module attributes {stable_mosaic.version = 11 : i64} {
  func.func @mha_kernel(%arg0: i32, %arg1: i32, %arg2: memref<1x8x32xf32, #tpu.memory_space<vmem>>, %arg3: memref<1x8x32xbf16, #tpu.memory_space<vmem>>, %arg4: memref<1x8x32xbf16, #tpu.memory_space<vmem>>, %arg5: memref<1x8x8xi8, #tpu.memory_space<vmem>>, %arg6: memref<32x32xbf16, #tpu.memory_space<vmem>>, %arg7: memref<1x32xf32, #tpu.memory_space<vmem>>, %arg8: memref<32x32xbf16, #tpu.memory_space<vmem>>, %arg9: memref<1x32xf32, #tpu.memory_space<vmem>>, %arg10: memref<32x32xbf16, #tpu.memory_space<vmem>>, %arg11: memref<1x32xf32, #tpu.memory_space<vmem>>, %arg12: memref<32x32xbf16, #tpu.memory_space<vmem>>, %arg13: memref<1x32xf32, #tpu.memory_space<vmem>>, %arg14: memref<1x32xf32, #tpu.memory_space<vmem>>, %arg15: memref<1x32xf32, #tpu.memory_space<vmem>>, %arg16: memref<1x8x32xf32, #tpu.memory_space<vmem>>, %arg17: memref<2x1x8x8xf32, #tpu.memory_space<vmem>>) attributes {dimension_semantics = [#tpu.dimension_semantics<parallel>, #tpu.dimension_semantics<parallel>], iteration_bounds = array<i64: 2, 1>, scalar_prefetch = 0 : i64, scratch_operands = 0 : i64, tpu.core_type = #tpu.core_type<tc>, window_params = [{transform_indices = @transform_0, window_bounds = array<i64: 1, 8, 32>}, {transform_indices = @transform_1, window_bounds = array<i64: 1, 8, 32>}, {transform_indices = @transform_2, window_bounds = array<i64: 1, 8, 32>}, {transform_indices = @transform_3, window_bounds = array<i64: 1, 8, 8>}, {pipeline_mode = #tpu.pipeline_mode<synchronous>, transform_indices = @transform_4, window_bounds = array<i64: 32, 32>}, {pipeline_mode = #tpu.pipeline_mode<synchronous>, transform_indices = @transform_5, window_bounds = array<i64: 1, 32>}, {pipeline_mode = #tpu.pipeline_mode<synchronous>, transform_indices = @transform_6, window_bounds = array<i64: 32, 32>}, {pipeline_mode = #tpu.pipeline_mode<synchronous>, transform_indices = @transform_7, window_bounds = array<i64: 1, 32>}, {pipeline_mode = #tpu.pipeline_mode<synchronous>, transform_indices = @transform_8, window_bounds = array<i64: 32, 32>}, {pipeline_mode = #tpu.pipeline_mode<synchronous>, transform_indices = @transform_9, window_bounds = array<i64: 1, 32>}, {pipeline_mode = #tpu.pipeline_mode<synchronous>, transform_indices = @transform_10, window_bounds = array<i64: 32, 32>}, {pipeline_mode = #tpu.pipeline_mode<synchronous>, transform_indices = @transform_11, window_bounds = array<i64: 1, 32>}, {pipeline_mode = #tpu.pipeline_mode<synchronous>, transform_indices = @transform_12, window_bounds = array<i64: 1, 32>}, {pipeline_mode = #tpu.pipeline_mode<synchronous>, transform_indices = @transform_13, window_bounds = array<i64: 1, 32>}, {transform_indices = @transform_14, window_bounds = array<i64: 1, 8, 32>}, {transform_indices = @transform_15, window_bounds = array<i64: 2, 1, 8, 8>}]} {
    %c0 = arith.constant 0 : index
    %c0_0 = arith.constant 0 : index
    %c0_1 = arith.constant 0 : index
    %0 = vector.load %arg2[%c0, %c0_0, %c0_1] : memref<1x8x32xf32, #tpu.memory_space<vmem>>, vector<1x8x32xf32>
    %1 = vector.shape_cast %0 : vector<1x8x32xf32> to vector<8x32xf32>
    %c0_2 = arith.constant 0 : index
    %c0_3 = arith.constant 0 : index
    %c0_4 = arith.constant 0 : index
    %2 = vector.load %arg3[%c0_2, %c0_3, %c0_4] : memref<1x8x32xbf16, #tpu.memory_space<vmem>>, vector<1x8x32xbf16>
    %3 = vector.shape_cast %2 : vector<1x8x32xbf16> to vector<8x32xbf16>
    %c0_5 = arith.constant 0 : index
    %c0_6 = arith.constant 0 : index
    %c0_7 = arith.constant 0 : index
    %4 = vector.load %arg4[%c0_5, %c0_6, %c0_7] : memref<1x8x32xbf16, #tpu.memory_space<vmem>>, vector<1x8x32xbf16>
    %5 = vector.shape_cast %4 : vector<1x8x32xbf16> to vector<8x32xbf16>
    %c0_8 = arith.constant 0 : index
    %c0_9 = arith.constant 0 : index
    %c0_10 = arith.constant 0 : index
    %6 = vector.load %arg5[%c0_8, %c0_9, %c0_10] : memref<1x8x8xi8, #tpu.memory_space<vmem>>, vector<1x8x8xi8>
    %7 = vector.shape_cast %6 : vector<1x8x8xi8> to vector<8x8xi8>
    %8 = arith.sitofp %7 : vector<8x8xi8> to vector<8x8xf32>
    %cst = arith.constant -1.000000e+30 : f32
    %9 = vector.broadcast %cst : f32 to vector<8x8xf32>
    %10 = arith.mulf %8, %9 : vector<8x8xf32>
    %11 = arith.truncf %1 : vector<8x32xf32> to vector<8x32xbf16>
    %c0_11 = arith.constant 0 : index
    %c0_12 = arith.constant 0 : index
    %12 = vector.load %arg6[%c0_11, %c0_12] : memref<32x32xbf16, #tpu.memory_space<vmem>>, vector<32x32xbf16>
    %cst_13 = arith.constant dense<0.000000e+00> : vector<8x32xf32>
    %13 = tpu.matmul %11, %12, %cst_13 {dimension_numbers = #tpu.dot_dimension_numbers<[1], [0], [0], [1], [0, 0, 1, 1], [], []>} : vector<8x32xbf16>, vector<32x32xbf16>, vector<8x32xf32> -> vector<8x32xf32>
    %c0_14 = arith.constant 0 : index
    %c0_15 = arith.constant 0 : index
    %14 = vector.load %arg7[%c0_14, %c0_15] : memref<1x32xf32, #tpu.memory_space<vmem>>, vector<1x32xf32>
    %15 = vector.shape_cast %14 : vector<1x32xf32> to vector<32xf32>
    %16 = vector.shape_cast %15 : vector<32xf32> to vector<1x32xf32>
    %17 = vector.broadcast %16 : vector<1x32xf32> to vector<8x32xf32>
    %18 = arith.addf %13, %17 : vector<8x32xf32>
    %cst_16 = arith.constant 2.500000e-01 : f32
    %19 = vector.broadcast %cst_16 : f32 to vector<8x32xf32>
    %20 = arith.mulf %18, %19 : vector<8x32xf32>
    %c0_17 = arith.constant 0 : index
    %c0_18 = arith.constant 0 : index
    %21 = vector.load %arg8[%c0_17, %c0_18] : memref<32x32xbf16, #tpu.memory_space<vmem>>, vector<32x32xbf16>
    %cst_19 = arith.constant dense<0.000000e+00> : vector<8x32xf32>
    %22 = tpu.matmul %3, %21, %cst_19 {dimension_numbers = #tpu.dot_dimension_numbers<[1], [0], [0], [1], [0, 0, 1, 1], [], []>} : vector<8x32xbf16>, vector<32x32xbf16>, vector<8x32xf32> -> vector<8x32xf32>
    %c0_20 = arith.constant 0 : index
    %c0_21 = arith.constant 0 : index
    %23 = vector.load %arg9[%c0_20, %c0_21] : memref<1x32xf32, #tpu.memory_space<vmem>>, vector<1x32xf32>
    %24 = vector.shape_cast %23 : vector<1x32xf32> to vector<32xf32>
    %25 = vector.shape_cast %24 : vector<32xf32> to vector<1x32xf32>
    %26 = vector.broadcast %25 : vector<1x32xf32> to vector<8x32xf32>
    %27 = arith.addf %22, %26 : vector<8x32xf32>
    %c0_22 = arith.constant 0 : index
    %c0_23 = arith.constant 0 : index
    %28 = vector.load %arg10[%c0_22, %c0_23] : memref<32x32xbf16, #tpu.memory_space<vmem>>, vector<32x32xbf16>
    %cst_24 = arith.constant dense<0.000000e+00> : vector<8x32xf32>
    %29 = tpu.matmul %5, %28, %cst_24 {dimension_numbers = #tpu.dot_dimension_numbers<[1], [0], [0], [1], [0, 0, 1, 1], [], []>} : vector<8x32xbf16>, vector<32x32xbf16>, vector<8x32xf32> -> vector<8x32xf32>
    %c0_25 = arith.constant 0 : index
    %c0_26 = arith.constant 0 : index
    %30 = vector.load %arg11[%c0_25, %c0_26] : memref<1x32xf32, #tpu.memory_space<vmem>>, vector<1x32xf32>
    %31 = vector.shape_cast %30 : vector<1x32xf32> to vector<32xf32>
    %32 = vector.shape_cast %31 : vector<32xf32> to vector<1x32xf32>
    %33 = vector.broadcast %32 : vector<1x32xf32> to vector<8x32xf32>
    %34 = arith.addf %29, %33 : vector<8x32xf32>
    %cst_27 = arith.constant 0.000000e+00 : f32
    %35 = vector.broadcast %cst_27 : f32 to vector<8x32xf32>
    %36 = vector.extract_strided_slice %20 {offsets = [0, 0], sizes = [8, 16], strides = [1, 1]} : vector<8x32xf32> to vector<8x16xf32>
    %37 = arith.truncf %36 : vector<8x16xf32> to vector<8x16xbf16>
    %38 = vector.extract_strided_slice %27 {offsets = [0, 0], sizes = [8, 16], strides = [1, 1]} : vector<8x32xf32> to vector<8x16xf32>
    %39 = arith.truncf %38 : vector<8x16xf32> to vector<8x16xbf16>
    %40 = vector.extract_strided_slice %34 {offsets = [0, 0], sizes = [8, 16], strides = [1, 1]} : vector<8x32xf32> to vector<8x16xf32>
    %41 = arith.truncf %40 : vector<8x16xf32> to vector<8x16xbf16>
    %42 = tpu.transpose %39, [1, 0] : vector<8x16xbf16> -> vector<16x8xbf16>
    %cst_28 = arith.constant dense<0.000000e+00> : vector<8x8xf32>
    %43 = tpu.matmul %37, %42, %cst_28 {dimension_numbers = #tpu.dot_dimension_numbers<[1], [0], [0], [1], [0, 0, 1, 1], [], []>} : vector<8x16xbf16>, vector<16x8xbf16>, vector<8x8xf32> -> vector<8x8xf32>
    %44 = arith.addf %43, %10 : vector<8x8xf32>
    %cst_29 = arith.constant dense<0xFF800000> : vector<8xf32>
    %45 = vector.multi_reduction <maximumf>, %44, %cst_29 [1] : vector<8x8xf32> to vector<8xf32>
    %46 = vector.shape_cast %45 : vector<8xf32> to vector<8x1xf32>
    %47 = vector.broadcast %46 : vector<8x1xf32> to vector<8x8xf32>
    %48 = arith.subf %44, %47 : vector<8x8xf32>
    %49 = math.exp %48 : vector<8x8xf32>
    %cst_30 = arith.constant dense<0.000000e+00> : vector<8xf32>
    %50 = vector.multi_reduction <add>, %49, %cst_30 [1] : vector<8x8xf32> to vector<8xf32>
    %51 = vector.shape_cast %50 : vector<8xf32> to vector<8x1xf32>
    %52 = tpu.reciprocal %51 {approx = true} : vector<8x1xf32> -> vector<8x1xf32>
    %53 = vector.broadcast %52 : vector<8x1xf32> to vector<8x8xf32>
    %54 = arith.mulf %49, %53 : vector<8x8xf32>
    %c0_31 = arith.constant 0 : index
    %c0_32 = arith.constant 0 : index
    %c0_33 = arith.constant 0 : index
    %c0_34 = arith.constant 0 : index
    %55 = vector.load %arg17[%c0_31, %c0_32, %c0_33, %c0_34] : memref<2x1x8x8xf32, #tpu.memory_space<vmem>>, vector<1x1x8x8xf32>
    %56 = vector.shape_cast %55 : vector<1x1x8x8xf32> to vector<8x8xf32>
    %57 = vector.shape_cast %54 : vector<8x8xf32> to vector<1x1x8x8xf32>
    tpu.vector_store %arg17[%c0_31, %c0_32, %c0_33, %c0_34], %57 {strides = array<i32>} : memref<2x1x8x8xf32, #tpu.memory_space<vmem>>, vector<1x1x8x8xf32>,
    %58 = arith.truncf %54 : vector<8x8xf32> to vector<8x8xbf16>
    %cst_35 = arith.constant dense<0.000000e+00> : vector<8x16xf32>
    %59 = tpu.matmul %58, %41, %cst_35 {dimension_numbers = #tpu.dot_dimension_numbers<[1], [0], [0], [1], [0, 0, 1, 1], [], []>} : vector<8x8xbf16>, vector<8x16xbf16>, vector<8x16xf32> -> vector<8x16xf32>
    %60 = arith.truncf %59 : vector<8x16xf32> to vector<8x16xbf16>
    %c0_36 = arith.constant 0 : index
    %c0_37 = arith.constant 0 : index
    %61 = vector.load %arg12[%c0_36, %c0_37] : memref<32x32xbf16, #tpu.memory_space<vmem>>, vector<16x32xbf16>
    %cst_38 = arith.constant dense<0.000000e+00> : vector<8x32xf32>
    %62 = tpu.matmul %60, %61, %cst_38 {dimension_numbers = #tpu.dot_dimension_numbers<[1], [0], [0], [1], [0, 0, 1, 1], [], []>} : vector<8x16xbf16>, vector<16x32xbf16>, vector<8x32xf32> -> vector<8x32xf32>
    %63 = arith.addf %35, %62 : vector<8x32xf32>
    %64 = vector.extract_strided_slice %20 {offsets = [0, 16], sizes = [8, 16], strides = [1, 1]} : vector<8x32xf32> to vector<8x16xf32>
    %65 = arith.truncf %64 : vector<8x16xf32> to vector<8x16xbf16>
    %66 = vector.extract_strided_slice %27 {offsets = [0, 16], sizes = [8, 16], strides = [1, 1]} : vector<8x32xf32> to vector<8x16xf32>
    %67 = arith.truncf %66 : vector<8x16xf32> to vector<8x16xbf16>
    %68 = vector.extract_strided_slice %34 {offsets = [0, 16], sizes = [8, 16], strides = [1, 1]} : vector<8x32xf32> to vector<8x16xf32>
    %69 = arith.truncf %68 : vector<8x16xf32> to vector<8x16xbf16>
    %70 = tpu.transpose %67, [1, 0] : vector<8x16xbf16> -> vector<16x8xbf16>
    %cst_39 = arith.constant dense<0.000000e+00> : vector<8x8xf32>
    %71 = tpu.matmul %65, %70, %cst_39 {dimension_numbers = #tpu.dot_dimension_numbers<[1], [0], [0], [1], [0, 0, 1, 1], [], []>} : vector<8x16xbf16>, vector<16x8xbf16>, vector<8x8xf32> -> vector<8x8xf32>
    %72 = arith.addf %71, %10 : vector<8x8xf32>
    %cst_40 = arith.constant dense<0xFF800000> : vector<8xf32>
    %73 = vector.multi_reduction <maximumf>, %72, %cst_40 [1] : vector<8x8xf32> to vector<8xf32>
    %74 = vector.shape_cast %73 : vector<8xf32> to vector<8x1xf32>
    %75 = vector.broadcast %74 : vector<8x1xf32> to vector<8x8xf32>
    %76 = arith.subf %72, %75 : vector<8x8xf32>
    %77 = math.exp %76 : vector<8x8xf32>
    %cst_41 = arith.constant dense<0.000000e+00> : vector<8xf32>
    %78 = vector.multi_reduction <add>, %77, %cst_41 [1] : vector<8x8xf32> to vector<8xf32>
    %79 = vector.shape_cast %78 : vector<8xf32> to vector<8x1xf32>
    %80 = tpu.reciprocal %79 {approx = true} : vector<8x1xf32> -> vector<8x1xf32>
    %81 = vector.broadcast %80 : vector<8x1xf32> to vector<8x8xf32>
    %82 = arith.mulf %77, %81 : vector<8x8xf32>
    %c1 = arith.constant 1 : index
    %c0_42 = arith.constant 0 : index
    %c0_43 = arith.constant 0 : index
    %c0_44 = arith.constant 0 : index
    %83 = vector.load %arg17[%c1, %c0_42, %c0_43, %c0_44] : memref<2x1x8x8xf32, #tpu.memory_space<vmem>>, vector<1x1x8x8xf32>
    %84 = vector.shape_cast %83 : vector<1x1x8x8xf32> to vector<8x8xf32>
    %85 = vector.shape_cast %82 : vector<8x8xf32> to vector<1x1x8x8xf32>
    tpu.vector_store %arg17[%c1, %c0_42, %c0_43, %c0_44], %85 {strides = array<i32>} : memref<2x1x8x8xf32, #tpu.memory_space<vmem>>, vector<1x1x8x8xf32>,
    %86 = arith.truncf %82 : vector<8x8xf32> to vector<8x8xbf16>
    %cst_45 = arith.constant dense<0.000000e+00> : vector<8x16xf32>
    %87 = tpu.matmul %86, %69, %cst_45 {dimension_numbers = #tpu.dot_dimension_numbers<[1], [0], [0], [1], [0, 0, 1, 1], [], []>} : vector<8x8xbf16>, vector<8x16xbf16>, vector<8x16xf32> -> vector<8x16xf32>
    %88 = arith.truncf %87 : vector<8x16xf32> to vector<8x16xbf16>
    %c16 = arith.constant 16 : index
    %c0_46 = arith.constant 0 : index
    %89 = vector.load %arg12[%c16, %c0_46] : memref<32x32xbf16, #tpu.memory_space<vmem>>, vector<16x32xbf16>
    %cst_47 = arith.constant dense<0.000000e+00> : vector<8x32xf32>
    %90 = tpu.matmul %88, %89, %cst_47 {dimension_numbers = #tpu.dot_dimension_numbers<[1], [0], [0], [1], [0, 0, 1, 1], [], []>} : vector<8x16xbf16>, vector<16x32xbf16>, vector<8x32xf32> -> vector<8x32xf32>
    %91 = arith.addf %63, %90 : vector<8x32xf32>
    %c0_48 = arith.constant 0 : index
    %c0_49 = arith.constant 0 : index
    %92 = vector.load %arg13[%c0_48, %c0_49] : memref<1x32xf32, #tpu.memory_space<vmem>>, vector<1x32xf32>
    %93 = vector.shape_cast %92 : vector<1x32xf32> to vector<32xf32>
    %94 = vector.shape_cast %93 : vector<32xf32> to vector<1x32xf32>
    %95 = vector.broadcast %94 : vector<1x32xf32> to vector<8x32xf32>
    %96 = arith.addf %91, %95 : vector<8x32xf32>
    %97 = arith.addf %96, %1 : vector<8x32xf32>
    %cst_50 = arith.constant dense<0.000000e+00> : vector<8xf32>
    %98 = vector.multi_reduction <add>, %97, %cst_50 [1] : vector<8x32xf32> to vector<8xf32>
    %99 = vector.shape_cast %98 : vector<8xf32> to vector<8x1xf32>
    %cst_51 = arith.constant 3.200000e+01 : f32
    %100 = vector.broadcast %cst_51 : f32 to vector<8x1xf32>
    %101 = arith.divf %99, %100 : vector<8x1xf32>
    %102 = vector.broadcast %101 : vector<8x1xf32> to vector<8x32xf32>
    %103 = arith.subf %97, %102 : vector<8x32xf32>
    %104 = arith.mulf %103, %103 : vector<8x32xf32>
    %cst_52 = arith.constant dense<0.000000e+00> : vector<8xf32>
    %105 = vector.multi_reduction <add>, %104, %cst_52 [1] : vector<8x32xf32> to vector<8xf32>
    %106 = vector.shape_cast %105 : vector<8xf32> to vector<8x1xf32>
    %cst_53 = arith.constant 3.200000e+01 : f32
    %107 = vector.broadcast %cst_53 : f32 to vector<8x1xf32>
    %108 = arith.divf %106, %107 : vector<8x1xf32>
    %109 = vector.broadcast %101 : vector<8x1xf32> to vector<8x32xf32>
    %110 = arith.subf %97, %109 : vector<8x32xf32>
    %cst_54 = arith.constant 9.99999974E-6 : f32
    %111 = vector.broadcast %cst_54 : f32 to vector<8x1xf32>
    %112 = arith.addf %108, %111 : vector<8x1xf32>
    %113 = math.rsqrt %112 : vector<8x1xf32>
    %114 = vector.broadcast %113 : vector<8x1xf32> to vector<8x32xf32>
    %115 = arith.mulf %110, %114 : vector<8x32xf32>
    %c0_55 = arith.constant 0 : index
    %c0_56 = arith.constant 0 : index
    %116 = vector.load %arg14[%c0_55, %c0_56] : memref<1x32xf32, #tpu.memory_space<vmem>>, vector<1x32xf32>
    %117 = vector.shape_cast %116 : vector<1x32xf32> to vector<32xf32>
    %118 = vector.shape_cast %117 : vector<32xf32> to vector<1x32xf32>
    %119 = vector.broadcast %118 : vector<1x32xf32> to vector<8x32xf32>
    %120 = arith.mulf %115, %119 : vector<8x32xf32>
    %c0_57 = arith.constant 0 : index
    %c0_58 = arith.constant 0 : index
    %121 = vector.load %arg15[%c0_57, %c0_58] : memref<1x32xf32, #tpu.memory_space<vmem>>, vector<1x32xf32>
    %122 = vector.shape_cast %121 : vector<1x32xf32> to vector<32xf32>
    %123 = vector.shape_cast %122 : vector<32xf32> to vector<1x32xf32>
    %124 = vector.broadcast %123 : vector<1x32xf32> to vector<8x32xf32>
    %125 = arith.addf %120, %124 : vector<8x32xf32>
    %c0_59 = arith.constant 0 : index
    %c0_60 = arith.constant 0 : index
    %c0_61 = arith.constant 0 : index
    %126 = vector.load %arg16[%c0_59, %c0_60, %c0_61] : memref<1x8x32xf32, #tpu.memory_space<vmem>>, vector<1x8x32xf32>
    %127 = vector.shape_cast %126 : vector<1x8x32xf32> to vector<8x32xf32>
    %128 = vector.shape_cast %125 : vector<8x32xf32> to vector<1x8x32xf32>
    tpu.vector_store %arg16[%c0_59, %c0_60, %c0_61], %128 {strides = array<i32>} : memref<1x8x32xf32, #tpu.memory_space<vmem>>, vector<1x8x32xf32>,
    return
  }
  func.func @transform_0(%arg0: i32, %arg1: i32) -> (i32, i32, i32) {
    %c0_i32 = arith.constant 0 : i32
    %c0_i32_0 = arith.constant 0 : i32
    return %arg0, %arg1, %c0_i32 : i32, i32, i32
  }
  func.func @transform_1(%arg0: i32, %arg1: i32) -> (i32, i32, i32) {
    %c0_i32 = arith.constant 0 : i32
    %c0_i32_0 = arith.constant 0 : i32
    %c0_i32_1 = arith.constant 0 : i32
    return %arg0, %c0_i32, %c0_i32_0 : i32, i32, i32
  }
  func.func @transform_2(%arg0: i32, %arg1: i32) -> (i32, i32, i32) {
    %c0_i32 = arith.constant 0 : i32
    %c0_i32_0 = arith.constant 0 : i32
    %c0_i32_1 = arith.constant 0 : i32
    return %arg0, %c0_i32, %c0_i32_0 : i32, i32, i32
  }
  func.func @transform_3(%arg0: i32, %arg1: i32) -> (i32, i32, i32) {
    %c0_i32 = arith.constant 0 : i32
    %c0_i32_0 = arith.constant 0 : i32
    return %arg0, %arg1, %c0_i32 : i32, i32, i32
  }
  func.func @transform_4(%arg0: i32, %arg1: i32) -> (i32, i32) {
    %c0_i32 = arith.constant 0 : i32
    %c0_i32_0 = arith.constant 0 : i32
    %c0_i32_1 = arith.constant 0 : i32
    return %c0_i32, %c0_i32_0 : i32, i32
  }
  func.func @transform_5(%arg0: i32, %arg1: i32) -> (i32, i32) {
    %c0_i32 = arith.constant 0 : i32
    %c0_i32_0 = arith.constant 0 : i32
    %c0_i32_1 = arith.constant 0 : i32
    return %c0_i32, %c0_i32_0 : i32, i32
  }
  func.func @transform_6(%arg0: i32, %arg1: i32) -> (i32, i32) {
    %c0_i32 = arith.constant 0 : i32
    %c0_i32_0 = arith.constant 0 : i32
    %c0_i32_1 = arith.constant 0 : i32
    return %c0_i32, %c0_i32_0 : i32, i32
  }
  func.func @transform_7(%arg0: i32, %arg1: i32) -> (i32, i32) {
    %c0_i32 = arith.constant 0 : i32
    %c0_i32_0 = arith.constant 0 : i32
    %c0_i32_1 = arith.constant 0 : i32
    return %c0_i32, %c0_i32_0 : i32, i32
  }
  func.func @transform_8(%arg0: i32, %arg1: i32) -> (i32, i32) {
    %c0_i32 = arith.constant 0 : i32
    %c0_i32_0 = arith.constant 0 : i32
    %c0_i32_1 = arith.constant 0 : i32
    return %c0_i32, %c0_i32_0 : i32, i32
  }
  func.func @transform_9(%arg0: i32, %arg1: i32) -> (i32, i32) {
    %c0_i32 = arith.constant 0 : i32
    %c0_i32_0 = arith.constant 0 : i32
    %c0_i32_1 = arith.constant 0 : i32
    return %c0_i32, %c0_i32_0 : i32, i32
  }
  func.func @transform_10(%arg0: i32, %arg1: i32) -> (i32, i32) {
    %c0_i32 = arith.constant 0 : i32
    %c0_i32_0 = arith.constant 0 : i32
    %c0_i32_1 = arith.constant 0 : i32
    return %c0_i32, %c0_i32_0 : i32, i32
  }
  func.func @transform_11(%arg0: i32, %arg1: i32) -> (i32, i32) {
    %c0_i32 = arith.constant 0 : i32
    %c0_i32_0 = arith.constant 0 : i32
    %c0_i32_1 = arith.constant 0 : i32
    return %c0_i32, %c0_i32_0 : i32, i32
  }
  func.func @transform_12(%arg0: i32, %arg1: i32) -> (i32, i32) {
    %c0_i32 = arith.constant 0 : i32
    %c0_i32_0 = arith.constant 0 : i32
    %c0_i32_1 = arith.constant 0 : i32
    return %c0_i32, %c0_i32_0 : i32, i32
  }
  func.func @transform_13(%arg0: i32, %arg1: i32) -> (i32, i32) {
    %c0_i32 = arith.constant 0 : i32
    %c0_i32_0 = arith.constant 0 : i32
    %c0_i32_1 = arith.constant 0 : i32
    return %c0_i32, %c0_i32_0 : i32, i32
  }
  func.func @transform_14(%arg0: i32, %arg1: i32) -> (i32, i32, i32) {
    %c0_i32 = arith.constant 0 : i32
    %c0_i32_0 = arith.constant 0 : i32
    return %arg0, %arg1, %c0_i32 : i32, i32, i32
  }
  func.func @transform_15(%arg0: i32, %arg1: i32) -> (i32, i32, i32, i32) {
    %c0_i32 = arith.constant 0 : i32
    %c0_i32_0 = arith.constant 0 : i32
    %c0_i32_1 = arith.constant 0 : i32
    return %c0_i32, %arg0, %arg1, %c0_i32_0 : i32, i32, i32, i32
  }
}

</mosaic_0001>

<bundles_post_ra>
// kernel: tpu_custom_call.1
= control target key start
LH: loop header
LB: loop body
LE: loop exit
PB: predicated region body
PF: predicated region fallthrough
CT: control target
= control target key end

     0   :  { %s2736_s0 = inlined_call_operand.hbm [shape: f32[2,8,32], index: 0, kind: input, shape index: {}]   ;;  %s2737_s1 = inlined_call_operand.hbm [shape: bf16[2,8,32], index: 1, kind: input, shape index: {}]   ;;  %s2738_s2 = inlined_call_operand.hbm [shape: bf16[2,8,32], index: 2, kind: input, shape index: {}]   ;;  %s2739_s3 = inlined_call_operand.hbm [shape: s8[2,8,8], index: 3, kind: input, shape index: {}]   ;;  %s2740_s4 = inlined_call_operand.hbm [shape: bf16[32,32], index: 4, kind: input, shape index: {}]   ;;  %s2741_s5 = inlined_call_operand.vmem [shape: f32[1,32], index: 5, kind: input, shape index: {}]   ;;  %s2742_s6 = inlined_call_operand.vmem [shape: bf16[32,32], index: 6, kind: input, shape index: {}]   ;;  %s2743_s7 = inlined_call_operand.vmem [shape: f32[1,32], index: 7, kind: input, shape index: {}]   ;;  %s2744_s8 = inlined_call_operand.hbm [shape: bf16[32,32], index: 8, kind: input, shape index: {}]   ;;  %s2745_s9 = inlined_call_operand.hbm [shape: f32[1,32], index: 9, kind: input, shape index: {}]   ;;  %s2746_s10 = inlined_call_operand.vmem [shape: bf16[32,32], index: 10, kind: input, shape index: {}]   ;;  %s2747_s11 = inlined_call_operand.vmem [shape: f32[1,32], index: 11, kind: input, shape index: {}]   ;;  %s2748_s12 = inlined_call_operand.vmem [shape: f32[1,32], index: 12, kind: input, shape index: {}]   ;;  %s2749_s13 = inlined_call_operand.vmem [shape: f32[1,32], index: 13, kind: input, shape index: {}]   ;;  %s2750_s14 = inlined_call_operand.hbm [shape: f32[2,8,32], index: 14, kind: output, shape index: {0}]   ;;  %s2751_s15 = inlined_call_operand.hbm [shape: f32[2,2,8,8], index: 15, kind: output, shape index: {1}]  }
   0x1   :  { %2774 = sst [smem:[#allocation31_spill]] %s2737_s1 }
   0x2   :  { %2775 = sst [smem:[#allocation32_spill]] %s2740_s4 }
   0x3   :  { %2776 = sst [smem:[#allocation33_spill]] %s2741_s5 }
   0x4   :  { %2777 = sst [smem:[#allocation34_spill]] %s2743_s7 }
   0x5   :  { %2778 = sst [smem:[#allocation35_spill]] %s2744_s8 }
   0x6   :  { %2779 = sst [smem:[#allocation36_spill]] %s2746_s10 }
   0x7   :  { %2780 = sst [smem:[#allocation37_spill]] %s2747_s11 }
   0x8   :  { %2781 = sst [smem:[#allocation38_spill]] %s2748_s12 }
   0x9   :  { %2782 = sst [smem:[#allocation39_spill]] %s2749_s13 }
   0xa   :  { %2783 = sst [smem:[#allocation40_spill]] %s2750_s14 }
   0xb   :  { %2784 = sst [smem:[#allocation41_spill]] %s2751_s15 }
   0xc   :  { %21 = vsyncpa [#allocation3], 0 }
   0xd   :  { %23 = vsyncpa [#allocation3 + $0x1], 0 }
   0xe   :  { %24 = vsyncpa [#allocation6], 0 }
   0xf   :  { %26 = vsyncpa [#allocation6 + $0x1], 0 }
  0x10   :  { %27 = vsyncpa [#allocation9], 0 }
  0x11   :  { %29 = vsyncpa [#allocation9 + $0x1], 0 }
  0x12   :  { %30 = vsyncpa [#allocation12], 0 }
  0x13   :  { %31 = vsyncpa [#allocation4], 0 }
  0x14   :  { %33 = vsyncpa [#allocation4 + $0x1], 0 }
  0x15   :  { %34 = vsyncpa [#allocation16], 0 }
  0x16   :  { %36 = vsyncpa [#allocation16 + $0x1], 0  ;;  %s2223_s18 = smov 0   ;;  %s2225_s19 = smov 0  }
  0x17   :  { %s2227_s20 = smov 0   ;;  %s2229_s21 = smov 0  }
  0x18   :  { %s2231_s22 = smov 0   ;;  %s2233_s23 = smov 0  }
  0x19 LB: > { %2785 = sst [smem:[#allocation24_spill]] %s2104_s18  ;;  %s2254_s24 = sadd.s32 4294967295, %s2124_s23   ;;  %s2124_s23 = sphi %s2233_s23, %s42_s23   ;;  %s2120_s22 = sphi %s2231_s22, %s2839_s22   ;;  %s2116_s21 = sphi %s2229_s21, %s2838_s21   ;;  %s2112_s20 = sphi %s2227_s20, %s2834_s20   ;;  %s2108_s19 = sphi %s2225_s19, %s2837_s19   ;;  %s2104_s18 = sphi %s2223_s18, %s2836_s18  }
  0x1a   : > { %2786 = sst [smem:[#allocation25_spill]] %s2112_s20  ;;  %s1516_s25 = sadd.s32 4294967294, %s2124_s23  }
  0x1b   : > { %2787 = sst [smem:[#allocation26_spill]] %s2116_s21  ;;  %p76_p0 = scmp.ne.s32.totalorder %s2108_s19, %s2104_s18 }
  0x1c   : > { %p2756_p1 = scmp.eq.s32.totalorder %s2254_s24, 0  ;;  %p398_p3 = scmp.eq.s32.totalorder %s1516_s25, 1 }
  0x1d   : > { %p1517_p5 = scmp.ge.s32.totalorder %s2124_s23, 1  ;;  %p433_p7 = scmp.lt.s32.totalorder %s2124_s23, 3 }
  0x1e   : > { %p2263_p4 = por %p2756_p1, %p76_p0  ;;  %p2268_p6 = por %p398_p3, %p76_p0 }
  0x1f   : > { %p2273_p8 = pnand %p1517_p5, %p433_p7  ;;  %s2126_s29 = smov [#allocation10]  }
  0x20   : > { %s2788_s26 = scalar_select %p2263_p4, 1, 0 }
  0x21   : > { %s2789_s27 = scalar_select %p2268_p6, 1, 0 }
  0x22   : > { %s2791_s28 = scalar_select %p2273_p8, 1, 0 }
  0x23   : > { %2790 = sst [smem:[#allocation27_spill]] %s2789_s27  ;;  %s445_s30 = sshll.u32 %s2126_s29, 4  ;;  %s2277_s30 = int_to_ptr.vmem [resolvable:$true] %s445_s30 }
  0x24   : > { %p1675_p9 = pneg %p2273_p8  ;;  %s2127_s17 = smov [#allocation11]  }
  0x25   : > { %s467_s25 = sshll.u32 %s2127_s17, 4  ;;  %s2793_s4 = sld [smem:[#allocation32_spill]]  ;;  %s2288_s25 = int_to_ptr.vmem [resolvable:$true] %s467_s25 }
  0x26   : > { %p2284_p11 = pnand %p1675_p9, %p2756_p1 }
  0x28   : > { %s2792_s16 = scalar_select %p2284_p11, 1, 0 }
  0x29   : > { %p2298_p13 = pneg %p2284_p11 }
  0x2b   : > { %s1790_s14 = scalar_lea.hbm %s2793_s4, 256 }
  0x2c   : > { %p1791_p12 = scmp.ne.s32.totalorder %s2793_s4, %s1790_s14  ;;  %p1797_p5 = scmp.lt.u32.totalorder %s1790_s14, %s2793_s4 }
  0x2d   : > { %s2794_s12 = scalar_select %p2298_p13, 1, 0 }
  0x2e   : > { %p1793_p0 = pnand %p2298_p13, %p1791_p12 }
  0x30   : > { %p1794_p3 = pneg %p1793_p0 }
  0x32   : > { %p1799_p7 = pnand %p1797_p5, %p1794_p3 }
  0x34   : > { %1802 = shalt.err (!%p1799_p7)
}
  0x35   : > { %s1803_s13 = scalar_lea.vmem %s2277_s30, 256  ;;  %p1811_p2 = scmp.lt.s32.totalorder %s2277_s30, %s2277_s30 }
  0x36   : > { %p1804_p9 = scmp.ne.s32.totalorder %s2277_s30, %s1803_s13  ;;  %p1812_p6 = scmp.lt.s32.totalorder %s1803_s13, %s1803_s13 }
  0x38   : > { %p1806_p10 = pnand %p1804_p9, %p2298_p13  ;;  %p1813_p12 = por %p1812_p6, %p1811_p2 }
  0x3a   : > { %p1807_p1 = pneg %p1806_p10 }
  0x3c   : > { %p1814_p0 = pnand %p1813_p12, %p1807_p1 }
  0x3e   : > { %1817 = shalt.err (!%p1814_p0)
}
  0x3f   : > { %s2128_s18 = smov 64   ;;  %s2129_s14 = smov 4  }
  0x40   : > { %1678 = dma.hbm_to_vmem [thread:$0]  (!%p2284_p11), %s2793_s4, 256, %s2277_s30, [#allocation9], %s2128_s18, %s2128_s18, %s2129_s14  }
  0x41   : > { %s2795_s8 = sld [smem:[#allocation35_spill]] }
  0x47   : > { %s1818_s21 = scalar_lea.hbm %s2795_s8, 256 }
  0x48   : > { %p1819_p2 = scmp.ne.s32.totalorder %s2795_s8, %s1818_s21  ;;  %p1825_p10 = scmp.lt.u32.totalorder %s1818_s21, %s2795_s8 }
  0x4a   : > { %p1821_p1 = pnand %p1819_p2, %p2298_p13 }
  0x4c   : > { %p1822_p6 = pneg %p1821_p1 }
  0x4e   : > { %p1827_p3 = pnand %p1825_p10, %p1822_p6 }
  0x50   : > { %1830 = shalt.err (!%p1827_p3)
}
  0x51   : > { %s1831_s30 = scalar_lea.vmem %s2288_s25, 256  ;;  %p1839_p12 = scmp.lt.s32.totalorder %s2288_s25, %s2288_s25 }
  0x52   : > { %p1832_p5 = scmp.ne.s32.totalorder %s2288_s25, %s1831_s30  ;;  %p1840_p0 = scmp.lt.s32.totalorder %s1831_s30, %s1831_s30 }
  0x54   : > { %p1834_p7 = pnand %p1832_p5, %p2298_p13  ;;  %p1841_p2 = por %p1840_p0, %p1839_p12 }
  0x56   : > { %p1835_p9 = pneg %p1834_p7 }
  0x58   : > { %p1842_p1 = pnand %p1841_p2, %p1835_p9 }
  0x5a   : > { %1845 = shalt.err (!%p1842_p1)
}
  0x5b   : > { %1681 = dma.hbm_to_vmem [thread:$0]  (!%p2284_p11), %s2795_s8, 256, %s2288_s25, [#allocation12], %s2128_s18, %s2128_s18, %s2129_s14  }
  0x5c   : > { %s54_s11 = sadd.s32 1, %s2120_s22  ;;  %s63_s21 = sadd.s32 1, %s2112_s20 }
  0x5d   : > { %p56_p6 = scmp.ge.s32.totalorder %s54_s11, 2  ;;  %p70_p10 = scmp.ne.s32.totalorder %s2112_s20, %s2108_s19 }
  0x5e   : > { %p71_p3 = scmp.eq.s32.totalorder %s2124_s23, 0  ;;  %p1708_p5 = scmp.lt.s32.totalorder %s2124_s23, 2 }
  0x5f   : > { %s2841_s11 = smov (%p56_p6, %s54_s11), 0  ;;  %p2797_p9 = scmp.eq.s32.totalorder %s2254_s24, 1 }
  0x60   : > { %2796 = sst [smem:[#allocation28_spill]] %s2841_s11  ;;  %p72_p7 = por %p71_p3, %p70_p10 }
  0x61   : > { %p2352_p12 = por %p2797_p9, %p70_p10  ;;  %s58_s25 = ssub.s32 %s2120_s22, %s2841_s11 }
  0x62   : > { %s2359_s18 = sand.u32 1, %s2112_s20   ;;  %p61_p0 = scmp.eq.s32.totalorder %s58_s25, 0 }
  0x63   : > { %s2798_s15 = scalar_select %p2352_p12, 1, 0 }
  0x64   : > { %p2361_p2 = pnand %p1708_p5, %p72_p7  ;;  %s2764_s27 = sand.u32 1, %s2124_s23  }
  0x65   : > { %2799 = sst [smem:[#allocation29_spill]] %s2798_s15  ;;  %s2760_s29 = sshll.u32 %s2359_s18, 2 }
  0x66   : > { %s2800_s14 = scalar_select %p2361_p2, 1, 0 }
  0x67   : > { %s2368_s17 = scalar_select %p61_p0, %s2112_s20, %s63_s21  }
  0x68   : > { %s2761_s13 = sshll.u32 %s2120_s22, 6  ;;  %s2802_s1 = sld [smem:[#allocation31_spill]] }
  0x69   : > { %2801 = sst [smem:[#allocation30_spill]] %s2368_s17  ;;  %s527_s25 = scalar_lea.vmem [#allocation5], %s2760_s29 }
  0x6a   : > { %s534_s4 = sshll.u32 %s527_s25, 4  ;;  %s2384_s8 = scalar_lea.sflag [#allocation6], %s2764_s27  ;;  %s2380_s4 = int_to_ptr.vmem [resolvable:$true] %s534_s4 }
  0x6b   : > { %p2390_p6 = pneg %p2361_p2 }
  0x6e   : > { %s2376_s10 = scalar_lea.hbm %s2802_s1, %s2761_s13  ;;  %s1851_s25 = scalar_lea.hbm %s2802_s1, 128 }
  0x6f   : > { %s1846_s21 = scalar_lea.hbm %s2376_s10, 64  ;;  %p1852_p5 = scmp.lt.u32.totalorder %s2376_s10, %s2802_s1 }
  0x70   : > { %p1847_p1 = scmp.ne.s32.totalorder %s2376_s10, %s1846_s21  ;;  %p1853_p7 = scmp.lt.u32.totalorder %s1851_s25, %s1846_s21 }
  0x71   : > { %p1855_p0 = scmp.lt.u32.totalorder %s1846_s21, %s2376_s10 }
  0x72   : > { %p1849_p10 = pnand %p2390_p6, %p1847_p1  ;;  %p1854_p9 = por %p1853_p7, %p1852_p5 }
  0x74   : > { %p1850_p3 = pneg %p1849_p10  ;;  %p1856_p12 = por %p1855_p0, %p1854_p9 }
  0x76   : > { %p1857_p4 = pnand %p1856_p12, %p1850_p3 }
  0x78   : > { %1860 = shalt.err (!%p1857_p4)
}
  0x79   : > { %s1861_s27 = scalar_lea.vmem %s2380_s4, 64  ;;  %s2130_s30 = smov [#allocation5]  }
  0x7a   : > { %p1862_p1 = scmp.ne.s32.totalorder %s2380_s4, %s1861_s27  ;;  %s1866_s5 = sshll.u32 %s2130_s30, 4  ;;  %s1867_s5 = int_to_ptr.vmem [resolvable:$false] %s1866_s5 }
  0x7b   : > { %s1868_s29 = scalar_lea.vmem %s1867_s5, 128  ;;  %p1869_p11 = scmp.lt.s32.totalorder %s2380_s4, %s1867_s5 }
  0x7c   : > { %p1864_p10 = pnand %p1862_p1, %p2390_p6  ;;  %p1870_p13 = scmp.lt.s32.totalorder %s1868_s29, %s1861_s27 }
  0x7e   : > { %p1865_p8 = pneg %p1864_p10  ;;  %p1871_p5 = por %p1870_p13, %p1869_p11 }
  0x80   : > { %p1872_p7 = pnand %p1871_p5, %p1865_p8 }
  0x82   : > { %1875 = shalt.err (!%p1872_p7)
}
  0x83   : > { %1691 = dma.hbm_to_vmem [thread:$0]  (!%p2361_p2), %s2376_s10, 64, %s2380_s4, %s2384_s8  }
  0x84   : > { %s2804_s13 = sshll.u32 %s2120_s22, 6  ;;  %s2131_s5 = smov [#allocation13]  }
  0x85   : > { %s2419_s30 = scalar_lea.hbm %s2738_s2, %s2804_s13  ;;  %s481_s27 = sshll.u32 %s2131_s5, 4  ;;  %s482_s27 = int_to_ptr.vmem [resolvable:$true] %s481_s27 }
  0x86   : > { %s1522_s29 = sshll.u32 %s2359_s18, 3  ;;  %s1876_s20 = scalar_lea.hbm %s2745_s9, 16 }
  0x87   : > { %p1877_p4 = scmp.ne.s32.totalorder %s2745_s9, %s1876_s20  ;;  %p2805_p8 = scmp.ne.s32.totalorder %s2794_s12, 0 }
  0x88   : > { %p1883_p12 = scmp.lt.u32.totalorder %s1876_s20, %s2745_s9 }
  0x89   : > { %p1879_p11 = pnand %p1877_p4, %p2805_p8 }
  0x8b   : > { %p1880_p13 = pneg %p1879_p11 }
  0x8d   : > { %p1885_p3 = pnand %p1883_p12, %p1880_p13 }
  0x8f   : > { %1888 = shalt.err (!%p1885_p3)
}
  0x90   : > { %s1889_s13 = scalar_lea.vmem %s482_s27, 16  ;;  %s1896_s1 = scalar_lea.vmem %s482_s27, 32 }
  0x91   : > { %p1890_p9 = scmp.ne.s32.totalorder %s482_s27, %s1889_s13  ;;  %p1897_p10 = scmp.lt.s32.totalorder %s482_s27, %s482_s27 }
  0x92   : > { %p1898_p5 = scmp.lt.s32.totalorder %s1896_s1, %s1889_s13 }
  0x93   : > { %p1892_p0 = pnand %p1890_p9, %p2805_p8 }
  0x94   : > { %p1899_p7 = por %p1898_p5, %p1897_p10 }
  0x95   : > { %p1893_p1 = pneg %p1892_p0 }
  0x97   : > { %p1900_p2 = pnand %p1899_p7, %p1893_p1 }
  0x99   : > { %1903 = shalt.err (!%p1900_p2)
}
  0x9a   : > { %p2806_p4 = scmp.ne.s32.totalorder %s2792_s16, 0  ;;  %s1523_s20 = sshll.u32 %s2120_s22, 7 }
  0x9b   : > { %s508_s17 = scalar_lea.vmem [#allocation2], %s1522_s29  ;;  %s2444_s5 = scalar_lea.hbm %s2736_s0, %s1523_s20 }
  0x9c   : > { %1684 = dma.hbm_to_vmem [thread:$0]  (!%p2806_p4), %s2745_s9, 16, %s482_s27, [#allocation12]  }
  0x9d   : > { %s516_s12 = sshll.u32 %s508_s17, 4  ;;  %s505_s16 = scalar_lea.sflag [#allocation3], %s2359_s18  ;;  %s517_s12 = int_to_ptr.vmem [resolvable:$true] %s516_s12 }
  0x9e   : > { %s1904_s4 = scalar_lea.hbm %s2444_s5, 128  ;;  %s1909_s29 = scalar_lea.hbm %s2736_s0, 256 }
  0x9f   : > { %p1905_p2 = scmp.ne.s32.totalorder %s2444_s5, %s1904_s4  ;;  %p1910_p13 = scmp.lt.u32.totalorder %s2444_s5, %s2736_s0 }
  0xa0   : > { %p1911_p12 = scmp.lt.u32.totalorder %s1909_s29, %s1904_s4  ;;  %p1913_p9 = scmp.lt.u32.totalorder %s1904_s4, %s2444_s5 }
  0xa1   : > { %p1907_p8 = pnand %p1905_p2, %p2390_p6 }
  0xa2   : > { %p1912_p3 = por %p1911_p12, %p1910_p13 }
  0xa3   : > { %p1908_p11 = pneg %p1907_p8 }
  0xa4   : > { %p1914_p0 = por %p1913_p9, %p1912_p3 }
  0xa6   : > { %p1915_p1 = pnand %p1914_p0, %p1908_p11 }
  0xa8   : > { %1918 = shalt.err (!%p1915_p1)
}
  0xa9   : > { %s1919_s7 = scalar_lea.vmem %s517_s12, 128  ;;  %s2132_s15 = smov [#allocation2]  }
  0xaa   : > { %p1920_p10 = scmp.ne.s32.totalorder %s517_s12, %s1919_s7  ;;  %s1924_s20 = sshll.u32 %s2132_s15, 4  ;;  %s1925_s20 = int_to_ptr.vmem [resolvable:$false] %s1924_s20 }
  0xab   : > { %s1926_s17 = scalar_lea.vmem %s1925_s20, 256  ;;  %p1927_p4 = scmp.lt.s32.totalorder %s517_s12, %s1925_s20 }
  0xac   : > { %p1922_p5 = pnand %p1920_p10, %p2390_p6  ;;  %p1928_p2 = scmp.lt.s32.totalorder %s1926_s17, %s1919_s7 }
  0xae   : > { %p1923_p7 = pneg %p1922_p5  ;;  %p1929_p8 = por %p1928_p2, %p1927_p4 }
  0xb0   : > { %p1930_p12 = pnand %p1929_p8, %p1923_p7 }
  0xb2   : > { %1933 = shalt.err (!%p1930_p12)
}
  0xb3   : > { %p2807_p13 = scmp.ne.s32.totalorder %s2800_s14, 0  ;;  %s2808_s21 = sshll.u32 %s2359_s18, 2 }
  0xb4   : > { %s545_s25 = scalar_lea.vmem [#allocation7], %s2808_s21  ;;  %s1528_s27 = sshll.u32 %s2359_s18, 1 }
  0xb5   : > { %1688 = dma.hbm_to_vmem [thread:$0]  (!%p2807_p13), %s2444_s5, 128, %s517_s12, %s505_s16  }
  0xb6   : > { %s552_s4 = sshll.u32 %s545_s25, 4  ;;  %s1934_s10 = scalar_lea.hbm %s2419_s30, 64  ;;  %s553_s4 = int_to_ptr.vmem [resolvable:$true] %s552_s4 }
  0xb7   : > { %p1935_p11 = scmp.ne.s32.totalorder %s2419_s30, %s1934_s10  ;;  %s1939_s1 = scalar_lea.hbm %s2738_s2, 128 }
  0xb8   : > { %p1940_p0 = scmp.lt.u32.totalorder %s2419_s30, %s2738_s2  ;;  %p1941_p1 = scmp.lt.u32.totalorder %s1939_s1, %s1934_s10 }
  0xb9   : > { %p1937_p3 = pnand %p1935_p11, %p2390_p6  ;;  %p1943_p5 = scmp.lt.u32.totalorder %s1934_s10, %s2419_s30 }
  0xba   : > { %p1942_p10 = por %p1941_p1, %p1940_p0 }
  0xbb   : > { %p1938_p9 = pneg %p1937_p3 }
  0xbc   : > { %p1944_p7 = por %p1943_p5, %p1942_p10 }
  0xbe   : > { %p1945_p4 = pnand %p1944_p7, %p1938_p9 }
  0xc0   : > { %1948 = shalt.err (!%p1945_p4)
}
  0xc1   : > { %s1949_s12 = scalar_lea.vmem %s553_s4, 64  ;;  %s2133_s5 = smov [#allocation7]  }
  0xc2   : > { %p1950_p2 = scmp.ne.s32.totalorder %s553_s4, %s1949_s12  ;;  %s1954_s16 = sshll.u32 %s2133_s5, 4  ;;  %s1955_s16 = int_to_ptr.vmem [resolvable:$false] %s1954_s16 }
  0xc3   : > { %s1956_s20 = scalar_lea.vmem %s1955_s16, 128  ;;  %p1957_p11 = scmp.lt.s32.totalorder %s553_s4, %s1955_s16 }
  0xc4   : > { %p1952_p8 = pnand %p1950_p2, %p2390_p6  ;;  %p1958_p3 = scmp.lt.s32.totalorder %s1956_s20, %s1949_s12 }
  0xc6   : > { %p1953_p12 = pneg %p1952_p8  ;;  %p1959_p13 = por %p1958_p3, %p1957_p11 }
  0xc8   : > { %p1960_p0 = pnand %p1959_p13, %p1953_p12 }
  0xca   : > { %1963 = shalt.err (!%p1960_p0)
}
  0xcb   : > { %p2809_p1 = scmp.ne.s32.totalorder %s2800_s14, 0  ;;  %s1529_s17 = sshll.u32 %s2120_s22, 5 }
  0xcc   : > { %s563_s21 = scalar_lea.vmem [#allocation8], %s1528_s27  ;;  %s2491_s13 = scalar_lea.hbm %s2739_s3, %s1529_s17 }
  0xcd   : > { %1694 = dma.hbm_to_vmem [thread:$0]  (!%p2809_p1), %s2419_s30, 64, %s553_s4, %s2384_s8  }
  0xce   : > { %s571_s25 = sshll.u32 %s563_s21, 4  ;;  %s2810_s1 = sand.u32 1, %s2124_s23   ;;  %s572_s25 = int_to_ptr.vmem [resolvable:$true] %s571_s25 }
  0xcf   : > { %s560_s7 = scalar_lea.sflag [#allocation9], %s2810_s1  ;;  %s1964_s15 = scalar_lea.hbm %s2491_s13, 32 }
  0xd0   : > { %p1965_p13 = scmp.ne.s32.totalorder %s2491_s13, %s1964_s15  ;;  %s1969_s30 = scalar_lea.hbm %s2739_s3, 64 }
  0xd1   : > { %p1970_p5 = scmp.lt.u32.totalorder %s2491_s13, %s2739_s3  ;;  %p1971_p7 = scmp.lt.u32.totalorder %s1969_s30, %s1964_s15 }
  0xd2   : > { %p1967_p9 = pnand %p1965_p13, %p2390_p6  ;;  %p1973_p2 = scmp.lt.u32.totalorder %s1964_s15, %s2491_s13 }
  0xd3   : > { %p1972_p4 = por %p1971_p7, %p1970_p5 }
  0xd4   : > { %p1968_p10 = pneg %p1967_p9 }
  0xd5   : > { %p1974_p8 = por %p1973_p2, %p1972_p4 }
  0xd7   : > { %p1975_p12 = pnand %p1974_p8, %p1968_p10 }
  0xd9   : > { %1978 = shalt.err (!%p1975_p12)
}
  0xda   : > { %s1979_s12 = scalar_lea.vmem %s572_s25, 32  ;;  %s2134_s5 = smov [#allocation8]  }
  0xdb   : > { %p1980_p11 = scmp.ne.s32.totalorder %s572_s25, %s1979_s12  ;;  %s1984_s16 = sshll.u32 %s2134_s5, 4  ;;  %s1985_s16 = int_to_ptr.vmem [resolvable:$false] %s1984_s16 }
  0xdc   : > { %s1986_s20 = scalar_lea.vmem %s1985_s16, 64  ;;  %p1987_p13 = scmp.lt.s32.totalorder %s572_s25, %s1985_s16 }
  0xdd   : > { %p1982_p3 = pnand %p1980_p11, %p2390_p6  ;;  %p1988_p9 = scmp.lt.s32.totalorder %s1986_s20, %s1979_s12 }
  0xdf   : > { %p1983_p0 = pneg %p1982_p3  ;;  %p1989_p1 = por %p1988_p9, %p1987_p13 }
  0xe1   : > { %p1990_p5 = pnand %p1989_p1, %p1983_p0 }
  0xe3   : > { %1993 = shalt.err (!%p1990_p5)
}
  0xe4   : > { %p2811_p7 = scmp.ne.s32.totalorder %s2800_s14, 0  ;;  %p2812_p10 = scmp.ne.s32.totalorder %s2791_s28, 0 }
  0xe5   : > { %s2515_s11 = sand.u32 (!%p2812_p10), 1, %s2108_s19   ;;  %p2813_p6 = scmp.ne.s32.totalorder (!%p2812_p10), %s2788_s26, 0 }
  0xe6   : > { %1697 = dma.hbm_to_vmem [thread:$0]  (!%p2811_p7), %s2491_s13, 32, %s572_s25, %s560_s7  }
  0xe7   : > { %580 = sbr.rel (%p2812_p10) target bundleno = 1889 (0x761), region = 76  ;;  %s1531_s17 = sshll.u32 (!%p2812_p10), %s2515_s11, 3 }
  0xe8   : > { %s583_s21 = scalar_lea.sflag (!%p2812_p10), [#allocation3], %s2515_s11  ;;  %s2521_s10 = scalar_lea.vmem (!%p2812_p10), [#allocation2], %s1531_s17 }
  0xee   : > { %2075 = dma.done.wait (%p2813_p6), %s583_s21, 128  }
  0xef   : > { %2077 = vsyncadd (%p2813_p6), %s583_s21, 4294967168  ;;  %s591_s28 = sand.u32 1, %s2254_s24   ;;  %s1532_s14 = sshll.u32 %s2515_s11, 2 }
  0xf0   : > { %s592_s25 = scalar_lea.sflag [#allocation6], %s591_s28  ;;  %s595_s29 = scalar_lea.vmem [#allocation5], %s1532_s14 }
  0xf1   : > { %2079 = dma.done.wait (%p2813_p6), %s592_s25, 128  }
  0xf2   : > { %2081 = vsyncadd (%p2813_p6), %s592_s25, 4294967168  ;;  %s1534_s13 = sshll.u32 %s2515_s11, 1  ;;  %s2534_s1 = scalar_lea.vmem [#allocation7], %s1532_s14 }
  0xf3   : > { %s610_s7 = scalar_lea.sflag [#allocation9], %s591_s28  ;;  %s2536_s15 = scalar_lea.vmem [#allocation8], %s1534_s13 }
  0xf4   : > { %2083 = dma.done.wait (%p2813_p6), %s610_s7, 32  }
  0xf5   : > { %2085 = vsyncadd (%p2813_p6), %s610_s7, 4294967264  ;;  %p2814_p1 = scmp.eq.s32.totalorder %s2254_s24, 0 }
  0xf7   : > { %2087 = dma.done.wait (%p2814_p1), [#allocation9], 256   ;;  %p2815_p4 = pmov %p2814_p1 }
  0xf8   : > { %p2816_p2 = pmov %p2814_p1 }
  0xf9   : > { %2089 = vsyncadd (%p2815_p4), [#allocation9], 4294967040 }
  0xfa   : > { %2091 = dma.done.wait (%p2816_p2), [#allocation12], 272   ;;  %p2817_p8 = pmov %p2814_p1 }
  0xfb   : > { %v2135_v0 = vmov 0.0   ;;  %vm2136_vm0 = vmmov 0   ;;  %v1772_v1 = vld [vmem:[%s2742_s6] sm:$0xff]   ;;  %v1774_v3 = vld [vmem:[%s2742_s6 + $0x8] sm:$0xff]   ;;  %v694_v4 = vld [vmem:[%s595_s29] sm:$0xf] }
  0xfc   : > { %2093 = vsyncadd (%p2817_p8), [#allocation12], 4294967024  ;;  %1599 = vmatprep.subr.bf16.mxu1 %v2135_v0  ;;  %1591 = vmatprep.subr.bf16.mxu0 %v2135_v0  ;;  %v1773_v2 = vld [vmem:[#allocation10] sm:$0xff]   ;;  %vm724_vm1 = vcmask 261120   ;;  %v1775_v5 = vld [vmem:[#allocation10 + $0x8] sm:$0xff]   ;;  %s2818_s27 = sld [smem:[#allocation34_spill]] }
  0xfd   : > { %1603 = vmatprep.mubr.msk.bf16.mxu1 %vm2136_vm0, %v2135_v0  ;;  %1595 = vmatprep.mubr.msk.bf16.mxu0 %vm2136_vm0, %v2135_v0  ;;  %v2565_v6 = vld [vmem:[%s2521_s10] sm:$0xff]  ;;  %s2819_s16 = sld [smem:[#allocation33_spill]]  ;;  %vm904_vm2 = vcmask 130048   ;;  %s2137_s20 = smov 112   ;;  %v1776_v24 = vld [vmem:[#allocation11] sm:$0xff]   ;;  %vm951_vm3 = vcmask 64512  }
  0xfe   : > { %1600 = vmatpush3.bf16.msra.mxu1 %v1772_v1  ;;  %1592 = vmatpush3.bf16.msra.mxu0 %v1773_v2  ;;  %v700_v7 = vpack.c.bf16 %v2565_v6, %v2565_v6  ;;  %v1777_v25 = vld [vmem:[#allocation11 + $0x8] sm:$0xff]   ;;  %v1548_v54 = vld [vmem:[#allocation13] ss:$0 sm:$0xff]  ;;  %vm968_vm4 = vcmask 1043456   ;;  %s1539_s21 = sshll.u32 %s2515_s11, 4  ;;  %s2820_s25 = sld [smem:[#allocation36_spill]] }
  0xff   : > { %1601 = vmatprep.subr.bf16.mxu1 %v2135_v0  ;;  %1593 = vmatprep.subr.bf16.mxu0 %v2135_v0  ;;  %v695_v26 = vld [vmem:[%s2534_s1] sm:$0xf]  ;;  %v696_v30 = vld [vmem:[%s2536_s15] sm:$0x3]  ;;  %s2610_s10 = scalar_lea.vmem [#allocation15], %s1539_s21  ;;  %s2821_s15 = sld [smem:[#allocation37_spill]] }
 0x100   : > { %v697_v31 = vunpack.c.0.s8 %v696_v30  ;;  %s2822_s26 = sld [smem:[#allocation26_spill]]  ;;  %s2823_s8 = sld [smem:[#allocation29_spill]] }
 0x101   : > { %s2824_s4 = sld [smem:[#allocation41_spill]]  ;;  %s1304_s12 = sshll.u32 %s2610_s10, 4  ;;  %s2647_s12 = int_to_ptr.vmem [resolvable:$true] %s1304_s12 }
 0x102   : > { %1602 = vmatpush3.bf16.msra.mxu1 %v1774_v3  ;;  %1594 = vmatpush3.bf16.msra.mxu0 %v1775_v5  ;;  %v1544_v8 = vld [vmem:[%s2818_s27] ss:$0 sm:$0xff]  ;;  %v698_v32 = vcvt.s32.f32 %v697_v31  ;;  %s1277_s5 = scalar_lea.sflag [#allocation16], %s2515_s11 }
 0x103   : > { %1615 = vmatprep.subr.bf16.mxu1 %v2135_v0  ;;  %1607 = vmatprep.subr.bf16.mxu0 %v2135_v0  ;;  %v1540_v9 = vld [vmem:[%s2819_s16] ss:$0 sm:$0xff]  ;;  %s1994_s16 = scalar_lea.vmem %s2647_s12, 256 }
 0x104   : > { %v699_v33 = vmul.f32 -1e+30, %v698_v32  ;;  %v1779_v5 = vld [vmem:[%s2820_s25 + $0x8] sm:$0xff]   ;;  %p1995_p12 = scmp.ne.s32.totalorder %s2647_s12, %s1994_s16 }
 0x105   : > { %1604 = vmatmul.mubr.msk.bf16.vlgmr.msra.gmra.mrb[0].mxu1 %vm724_vm1, %v694_v4  ;;  %1596 = vmatmul.mubr.msk.bf16.vlgmr.msra.gmra.mrb[0].mxu0 %vm724_vm1, %v700_v7 }
 0x106   : > { %1617 = vmatprep.mubr.msk.bf16.mxu1 %vm2136_vm0, %v2135_v0  ;;  %1611 = vmatprep.mubr.msk.bf16.mxu0 %vm2136_vm0, %v2135_v0  ;;  %s1566_s24 = sshll.u32 %s2822_s26, 7  ;;  %p2825_p11 = scmp.ne.s32.totalorder %s2823_s8, 0 }
 0x107   : > { %1608 = vmatpush3.bf16.msra.mxu0 %v1776_v24  ;;  %s2644_s27 = scalar_lea.hbm %s2824_s4, %s1566_s24 }
 0x108   : > { %1609 = vmatprep.subr.bf16.mxu0 %v2135_v0  ;;  %p1996_p3 = pnand %p1995_p12, %p2825_p11 }
 0x10a   : > { %p1997_p0 = pneg %p1996_p3 }
 0x10b   : > { %1610 = vmatpush3.bf16.msra.mxu0 %v1777_v25 }
 0x10c   : > { %1621 = vmatprep.subr.bf16.mxu0 %v2135_v0 }
 0x10e   : > { %1612 = vmatmul.mubr.msk.bf16.vlgmr.msra.gmra.mrb[4].mxu0 %vm724_vm1, %v695_v26 }
 0x10f   : > { %1623 = vmatprep.mubr.msk.bf16.mxu0 %vm2136_vm0, %v2135_v0 }
 0x1d8   : > { %v829_v10 = vpop.f32.mrb[0].mxu1  ;;  %v762_v13 = vpop.f32.mrb[0].mxu0 }
 0x1d9   : > { %v830_v11 = vadd.f32 %v1544_v8, %v829_v10  ;;  %v1605_v12 = vpop.f32.mrb[1].mxu1  ;;  %v763_v15 = vadd.f32 %v1540_v9, %v762_v13  ;;  %v1597_v16 = vpop.f32.mrb[1].mxu0 }
 0x1da   : > { %v832_v14 = vpop.f32.mrb[2].mxu1  ;;  %v765_v19 = vpop.f32.mrb[2].mxu0  ;;  %v1778_v12 = vld [vmem:[%s2820_s25] sm:$0xff]  }
 0x1db   : > { %v902_v17 = vpack.c.bf16 %v830_v11, %v830_v11  ;;  %v1606_v18 = vpop.f32.mrb[3].mxu1  ;;  %v768_v20 = vmul.f32 0.25, %v763_v15  ;;  %v1598_v21 = vpop.f32.mrb[3].mxu0 }
 0x1dd   : > { %v909_v22 = vsel %vm904_vm2, %v902_v17, 0  ;;  %1019 = vrot.lane.b32.xlu0 %v902_v17, %s2137_s20  ;;  %v901_v23 = vpack.c.bf16 %v768_v20, %v768_v20 }
 0x1de   : > { %1616 = vmatpush3.bf16.xpose.msra.mxu1 %v909_v22 }
 0x1df   : > { %1627 = vmatprep.subr.bf16.mxu1 %v2135_v0 }
 0x1e1   : > { %1016 = vrot.lane.b32.xlu0 %v901_v23, %s2137_s20  ;;  %v895_v51 = vpop.f32.mrb[4].mxu0 }
 0x1e2   : > { %v1613_v52 = vpop.f32.mrb[5].mxu0  ;;  %v896_v56 = vadd.f32 %v1548_v54, %v895_v51 }
 0x1e3   : > { %v898_v53 = vpop.f32.mrb[6].mxu0 }
 0x1e4   : > { %v1614_v55 = vpop.f32.mrb[7].mxu0  ;;  %v903_v57 = vpack.c.bf16 %v896_v56, %v896_v56 }
 0x1e5   : > { %1618 = vmatmul.mubr.msk.bf16.vlgmr.msra.gmra.mrb[4].mxu1 %vm904_vm2, %v901_v23 }
 0x1e6   : > { %1629 = vmatprep.mubr.msk.bf16.mxu1 %vm2136_vm0, %v2135_v0  ;;  %v970_v58 = vsel %vm968_vm4, %v903_v57, 0 }
 0x1e7   : > { %1622 = vmatpush3.bf16.msra.mxu0 %v970_v58 }
 0x1e8   : > { %1633 = vmatprep.subr.bf16.mxu0 %v2135_v0 }
 0x24f   : > { %v1020_v27 = vpop.permute.xlu0 %1019 }
 0x250   : > { %v1025_v28 = vsel %vm904_vm2, %v1020_v27, 0 }
 0x251   : > { %1628 = vmatpush3.bf16.xpose.msra.mxu1 %v1025_v28 }
 0x252   : > { %1639 = vmatprep.subr.bf16.mxu1 %v2135_v0 }
 0x253   : > { %v1017_v29 = vpop.permute.xlu0 %1016 }
 0x258   : > { %1630 = vmatmul.mubr.msk.bf16.vlgmr.msra.gmra.mrb[8].mxu1 %vm904_vm2, %v1017_v29 }
 0x259   : > { %1641 = vmatprep.mubr.msk.bf16.mxu1 %vm2136_vm0, %v2135_v0  ;;  %1640 = vmatpush3.bf16.msra.mxu1 %v1779_v5 }
 0x2b8   : > { %v945_v34 = vpop.f32.mrb[4].mxu1 }
 0x2b9   : > { %v946_v35 = vadd.f32 %v945_v34, %v699_v33  ;;  %v1619_v36 = vpop.f32.mrb[5].mxu1 }
 0x2ba   : > { %v948_v37 = vpop.f32.mrb[6].mxu1 }
 0x2bb   : > { %v1620_v38 = vpop.f32.mrb[7].mxu1  ;;  %v952_v39 = vsel %vm951_vm3, %v946_v35, -inf }
 0x2bc   : > { %953 = vmax.xlane.f32.xlu1 %v952_v39 }
 0x32b   : > { %v1061_v40 = vpop.f32.mrb[8].mxu1 }
 0x32c   : > { %v1062_v41 = vadd.f32 %v1061_v40, %v699_v33  ;;  %v1631_v42 = vpop.f32.mrb[9].mxu1 }
 0x32d   : > { %v1064_v43 = vpop.f32.mrb[10].mxu1 }
 0x32e   : > { %v1632_v44 = vpop.f32.mrb[11].mxu1  ;;  %v1067_v45 = vsel %vm951_vm3, %v1062_v41, -inf }
 0x32f   : > { %1068 = vmax.xlane.f32.xlu1 %v1067_v45 }
 0x349   : > { %v954_v46 = vpop.xlane.xlu1 %953 }
 0x34a   : > { %v955_v47 = vsub.f32 %v946_v35, %v954_v46 }
 0x34c   : > { %v956_v48 = vmul.f32 1.442695, %v955_v47 }
 0x34e   : > { %1780 = vpow2.f32 %v956_v48 }
 0x358   : > { %v1781_v49 = vpop.eup %1780 }
 0x359   : > { %v958_v50 = vsel %vm951_vm3, %v1781_v49, 0.0 }
 0x35a   : > { %959 = vadd.xlane.f32.xlu0 %v958_v50 }
 0x3bc   : > { %v1069_v59 = vpop.xlane.xlu1 %1068 }
 0x3bd   : > { %v1070_v60 = vsub.f32 %v1062_v41, %v1069_v59 }
 0x3bf   : > { %v1071_v61 = vmul.f32 1.442695, %v1070_v60 }
 0x3c1   : > { %1782 = vpow2.f32 %v1071_v61 }
 0x3cb   : > { %v1783_v62 = vpop.eup %1782 }
 0x3cc   : > { %v1073_v63 = vsel %vm951_vm3, %v1783_v62, 0.0 }
 0x3cd   : > { %1074 = vadd.xlane.f32.xlu1 %v1073_v63 }
 0x3de   : > { %1082 = vrot.lane.b32.xlu1 %v903_v57, %s2137_s20  ;;  %s2138_s20 = smov [#allocation15]  }
 0x3df   : > { %s1998_s21 = sshll.u32 %s2138_s20, 4  ;;  %s1999_s21 = int_to_ptr.vmem [resolvable:$false] %s1998_s21 }
 0x3e0   : > { %s2000_s28 = scalar_lea.vmem %s1999_s21, 512  ;;  %p2001_p13 = scmp.lt.s32.totalorder %s2647_s12, %s1999_s21 }
 0x3e1   : > { %p2002_p9 = scmp.lt.s32.totalorder %s2000_s28, %s1994_s16 }
 0x3e3   : > { %p2003_p5 = por %p2002_p9, %p2001_p13 }
 0x3e5   : > { %p2004_p7 = pnand %p2003_p5, %p1997_p0 }
 0x3e7   : > { %v960_v1 = vpop.xlane.xlu0 %959 }
 0x3e8   : > { %1784 = vrcp.f32 %v960_v1 }
 0x3f2   : > { %v1785_v2 = vpop.eup %1784 }
 0x3f3   : > { %v962_v3 = vmul.f32 %v1785_v2, %v1781_v49 }
 0x3f5   : > { %963 = vst.msk [vmem:[%s2610_s10] sm:$0xff] %vm951_vm3, %v962_v3  ;;  %v964_v4 = vpack.c.bf16 %v962_v3, %v962_v3 }
 0x3f7   : > { %1624 = vmatmul.mubr.msk.bf16.vlgmr.msra.gmra.mrb[8].mxu0 %vm951_vm3, %v964_v4 }
 0x3f8   : > { %1635 = vmatprep.mubr.msk.bf16.mxu0 %vm2136_vm0, %v2135_v0 }
 0x45a   : > { %v1075_v7 = vpop.xlane.xlu1 %1074 }
 0x45b   : > { %1786 = vrcp.f32 %v1075_v7 }
 0x45e   : > { %v1083_v8 = vpop.permute.xlu1 %1082 }
 0x45f   : > { %v1088_v9 = vsel %vm968_vm4, %v1083_v8, 0 }
 0x460   : > { %1634 = vmatpush3.bf16.msra.mxu0 %v1088_v9 }
 0x461   : > { %1645 = vmatprep.subr.bf16.mxu0 %v2135_v0 }
 0x465   : > { %v1787_v10 = vpop.eup %1786 }
 0x466   : > { %v1077_v11 = vmul.f32 %v1787_v10, %v1783_v62 }
 0x468   : > { %1555 = vst.msk [vmem:[%s2610_s10 + $0x8] sm:$0xff] %vm951_vm3, %v1077_v11  ;;  %v1080_v13 = vpack.c.bf16 %v1077_v11, %v1077_v11 }
 0x46a   : > { %1636 = vmatmul.mubr.msk.bf16.vlgmr.msra.gmra.mrb[12].mxu0 %vm951_vm3, %v1080_v13 }
 0x46b   : > { %1646 = vmatpush3.bf16.msra.mxu0 %v1778_v12  ;;  %1647 = vmatprep.mubr.msk.bf16.mxu0 %vm2136_vm0, %v2135_v0  ;;  %v1561_v0 = vld [vmem:[%s2821_s15] ss:$0 sm:$0xff] }
 0x4ca   : > { %v1006_v14 = vpop.f32.mrb[8].mxu0 }
 0x4cb   : > { %v1012_v15 = vpack.c.bf16 %v1006_v14, %v1006_v14  ;;  %v1625_v16 = vpop.f32.mrb[9].mxu0 }
 0x4cc   : > { %v1009_v17 = vpop.f32.mrb[10].mxu0 }
 0x4cd   : > { %v1626_v18 = vpop.f32.mrb[11].mxu0  ;;  %1648 = vmatmul.mubr.msk.bf16.vlgmr.msra.gmra.mrb[16].mxu0 %vm904_vm2, %v1012_v15 }
 0x53d   : > { %v1124_v19 = vpop.f32.mrb[12].mxu0 }
 0x53e   : > { %v1130_v20 = vpack.c.bf16 %v1124_v19, %v1124_v19  ;;  %v1637_v21 = vpop.f32.mrb[13].mxu0 }
 0x53f   : > { %v1127_v22 = vpop.f32.mrb[14].mxu0 }
 0x540   : > { %v1638_v23 = vpop.f32.mrb[15].mxu0  ;;  %1642 = vmatmul.mubr.msk.bf16.vlgmr.msra.gmra.mrb[12].mxu1 %vm904_vm2, %v1130_v20 }
 0x5a0   : > { %v1225_v24 = vpop.f32.mrb[16].mxu0 }
 0x5a1   : > { %v1649_v25 = vpop.f32.mrb[17].mxu0 }
 0x5a2   : > { %v1228_v26 = vpop.f32.mrb[18].mxu0 }
 0x5a3   : > { %v1650_v27 = vpop.f32.mrb[19].mxu0 }
 0x613   : > { %v1176_v28 = vpop.f32.mrb[12].mxu1 }
 0x614   : > { %v1226_v29 = vadd.f32 %v1225_v24, %v1176_v28  ;;  %v1643_v30 = vpop.f32.mrb[13].mxu1 }
 0x615   : > { %v1179_v31 = vpop.f32.mrb[14].mxu1 }
 0x616   : > { %v1238_v32 = vadd.f32 %v1561_v0, %v1226_v29  ;;  %v1644_v33 = vpop.f32.mrb[15].mxu1 }
 0x618   : > { %v1239_v34 = vadd.f32 %v1238_v32, %v2565_v6 }
 0x61a   : > { %v1240_v35 = vsel %vm724_vm1, %v1239_v34, 0.0 }
 0x61b   : > { %1241 = vadd.xlane.f32.xlu1 %v1240_v35 }
 0x6a8   : > { %v1242_v36 = vpop.xlane.xlu1 %1241 }
 0x6a9   : > { %v1244_v37 = vmul.f32 0.03125, %v1242_v36 }
 0x6ab   : > { %v1245_v38 = vsub.f32 %v1239_v34, %v1244_v37 }
 0x6ad   : > { %v1246_v39 = vmul.f32 %v1245_v38, %v1245_v38 }
 0x6af   : > { %v1247_v40 = vsel %vm724_vm1, %v1246_v39, 0.0 }
 0x6b0   : > { %1248 = vadd.xlane.f32.xlu0 %v1247_v40 }
 0x6b1   : > { %2007 = shalt.err (!%p2004_p7)
}
 0x6b2   : > { %s2008_s10 = scalar_lea.hbm %s2644_s27, 256  ;;  %s2012_s13 = scalar_lea.hbm %s2824_s4, 512 }
 0x6b3   : > { %p2009_p10 = scmp.ne.s32.totalorder %s2644_s27, %s2008_s10  ;;  %p2013_p4 = scmp.lt.u32.totalorder %s2644_s27, %s2824_s4 }
 0x6b4   : > { %p2014_p2 = scmp.lt.u32.totalorder %s2012_s13, %s2008_s10  ;;  %p2016_p12 = scmp.lt.u32.totalorder %s2008_s10, %s2644_s27 }
 0x6b5   : > { %p2010_p6 = pnand %p2009_p10, %p2825_p11 }
 0x6b6   : > { %p2015_p8 = por %p2014_p2, %p2013_p4 }
 0x6b7   : > { %p2011_p1 = pneg %p2010_p6 }
 0x6b8   : > { %p2017_p3 = por %p2016_p12, %p2015_p8 }
 0x6ba   : > { %p2018_p0 = pnand %p2017_p3, %p2011_p1 }
 0x6bc   : > { %2021 = shalt.err (!%p2018_p0)
}
 0x6bd   : > { %s2139_s15 = smov 128   ;;  %s2140_s18 = smov 256  }
 0x6be   : > { %s2141_s30 = smov 8   ;;  %s2826_s21 = sld [smem:[#allocation38_spill]] }
 0x6bf   : > { %1672 = dma.vmem_to_hbm [thread:$0]  (%p2825_p11), %s2647_s12, 256, %s2644_s27, %s1277_s5, %s2139_s15, %s2140_s18, %s2141_s30  }
 0x6c0   : > { %s2827_s14 = sld [smem:[#allocation39_spill]]  ;;  %s684_s29 = scalar_lea.vmem [#allocation14], %s1531_s17 }
 0x6c1   : > { %s1291_s13 = sshll.u32 %s684_s29, 4  ;;  %s2828_s5 = sld [smem:[#allocation40_spill]]  ;;  %s2688_s13 = int_to_ptr.vmem [resolvable:$true] %s1291_s13 }
 0x6c2   : > { %s1272_s7 = scalar_lea.sflag [#allocation4], %s2515_s11  ;;  %s2022_s15 = scalar_lea.vmem %s2688_s13, 128 }
 0x6c3   : > { %p2023_p13 = scmp.ne.s32.totalorder %s2688_s13, %s2022_s15  ;;  %s2142_s17 = smov [#allocation14]  }
 0x6c4   : > { %v1562_v44 = vld [vmem:[%s2826_s21] ss:$0 sm:$0xff]  ;;  %s2026_s26 = sshll.u32 %s2142_s17, 4  ;;  %s2027_s26 = int_to_ptr.vmem [resolvable:$false] %s2026_s26 }
 0x6c5   : > { %p2024_p9 = pnand %p2023_p13, %p2825_p11  ;;  %s2028_s18 = scalar_lea.vmem %s2027_s26, 256 }
 0x6c6   : > { %v1563_v46 = vld [vmem:[%s2827_s14] ss:$0 sm:$0xff]  ;;  %p2029_p7 = scmp.lt.s32.totalorder %s2688_s13, %s2027_s26  ;;  %p2030_p10 = scmp.lt.s32.totalorder %s2028_s18, %s2022_s15 }
 0x6c7   : > { %s2686_s1 = scalar_lea.hbm %s2828_s5, %s1566_s24  ;;  %p2025_p5 = pneg %p2024_p9 }
 0x6c8   : > { %p2031_p6 = por %p2030_p10, %p2029_p7 }
 0x6ca   : > { %p2032_p1 = pnand %p2031_p6, %p2025_p5 }
 0x73d   : > { %v1249_v6 = vpop.xlane.xlu0 %1248 }
 0x73e   : > { %v1250_v41 = vmul.f32 0.03125, %v1249_v6 }
 0x740   : > { %v1251_v42 = vadd.f32 1e-05, %v1250_v41 }
 0x742   : > { %1788 = vrsqrt.f32 %v1251_v42 }
 0x74c   : > { %v1789_v43 = vpop.eup %1788 }
 0x74d   : > { %v1253_v45 = vmul.f32 %v1789_v43, %v1245_v38 }
 0x74f   : > { %v1261_v47 = vmul.f32 %v1562_v44, %v1253_v45 }
 0x751   : > { %v1269_v48 = vadd.f32 %v1563_v46, %v1261_v47 }
 0x753   : > { %1270 = vst.msk [vmem:[%s684_s29] sm:$0xff] %vm724_vm1, %v1269_v48 }
 0x754   : > { %2035 = shalt.err (!%p2032_p1)
}
 0x755   : > { %s2036_s11 = scalar_lea.hbm %s2686_s1, 128  ;;  %s2040_s16 = scalar_lea.hbm %s2828_s5, 256 }
 0x756   : > { %p2037_p4 = scmp.ne.s32.totalorder %s2686_s1, %s2036_s11  ;;  %p2041_p12 = scmp.lt.u32.totalorder %s2686_s1, %s2828_s5 }
 0x757   : > { %p2042_p3 = scmp.lt.u32.totalorder %s2040_s16, %s2036_s11  ;;  %p2044_p13 = scmp.lt.u32.totalorder %s2036_s11, %s2686_s1 }
 0x758   : > { %p2038_p2 = pnand %p2037_p4, %p2825_p11 }
 0x759   : > { %p2043_p0 = por %p2042_p3, %p2041_p12 }
 0x75a   : > { %p2039_p8 = pneg %p2038_p2 }
 0x75b   : > { %p2045_p9 = por %p2044_p13, %p2043_p0 }
 0x75d   : > { %p2046_p5 = pnand %p2045_p9, %p2039_p8 }
 0x75f   : > { %2049 = shalt.err (!%p2046_p5)
}
 0x760   : > { %1671 = dma.vmem_to_hbm [thread:$0]  (%p2825_p11), %s2688_s13, 128, %s2686_s1, %s1272_s7  }
 0x761 PF: > { %s2829_s28 = sld [smem:[#allocation24_spill]]  ;;  %s2830_s10 = sld [smem:[#allocation27_spill]] }
 0x762   : > { %p2832_p10 = scmp.ge.s32.totalorder %s2124_s23, 2 }
 0x767   : > { %s1319_s14 = sand.u32 1, %s2829_s28   ;;  %p2831_p7 = scmp.ne.s32.totalorder %s2830_s10, 0 }
 0x768   : > { %s1320_s29 = scalar_lea.sflag [#allocation4], %s1319_s14 }
 0x769   : > { %p1699_p6 = pnand %p2832_p10, %p2831_p7 }
 0x76b   : > { %2095 = dma.done.wait (!%p1699_p6), %s1320_s29, 128  }
 0x76c   : > { %2097 = vsyncadd (!%p1699_p6), %s1320_s29, 4294967168  ;;  %s1329_s27 = scalar_lea.sflag [#allocation16], %s1319_s14 }
 0x76d   : > { %2099 = dma.done.wait (!%p1699_p6), %s1329_s27, 256  }
 0x76e   : > { %2101 = vsyncadd (!%p1699_p6), %s1329_s27, 4294967040  ;;  %s42_s23 = sadd.s32 1, %s2124_s23   ;;  %s2833_s8 = sld [smem:[#allocation25_spill]] }
 0x76f   : > { %p39_p1 = scmp.ge.s32.totalorder %s42_s23, 4   ;;  %s2834_s20 = sld [smem:[#allocation30_spill]] }
 0x770   : > { %s2835_s13 = sld [smem:[#allocation28_spill]]  ;;  %s2836_s18 = smov %s2108_s19 }
 0x771   : > { %s2838_s21 = smov %s2120_s22  ;;  %41 = sbr.rel (!%p39_p1) target bundleno = 25 (0x19), region = 188 }
 0x774   : > { %s2837_s19 = smov %s2833_s8 }
 0x776   : > { %s2839_s22 = smov %s2835_s13 }
 0x778   :  { %1334 = vsyncpa [#allocation3], 1 }
 0x779   :  { %1336 = vsyncpa [#allocation3 + $0x1], 1 }
 0x77a   :  { %1337 = vsyncpa [#allocation6], 1 }
 0x77b   :  { %1339 = vsyncpa [#allocation6 + $0x1], 1 }
 0x77c   :  { %1340 = vsyncpa [#allocation9], 1 }
 0x77d   :  { %1342 = vsyncpa [#allocation9 + $0x1], 1 }
 0x77e   :  { %1343 = vsyncpa [#allocation12], 1 }
 0x77f   :  { %1344 = vsyncpa [#allocation4], 1 }
 0x780   :  { %1346 = vsyncpa [#allocation4 + $0x1], 1 }
 0x781   :  { %1347 = vsyncpa [#allocation16], 1 }
 0x782   :  { %1349 = vsyncpa [#allocation16 + $0x1], 1 }

</bundles_post_ra>
